<compile_context>
chip_gen: v7x
topology: tpu7x:2x2x1
jax: 0.10.0
libtpu: 0.0.40
codegen_flags: <defaults>
</compile_context>

<pallas_src>
import math
from functools import partial

import jax
import jax.numpy as jnp
from jax.experimental import pallas as pl
from jax.experimental.pallas import tpu as pltpu


# ------------------------------- kernels -------------------------------------

def _complex_linear_kernel(xr_ref, xi_ref, wr_ref, wi_ref, br_ref, bi_ref,
                           or_ref, oi_ref, accr_ref, acci_ref):
    """complex_kernel=True tile:
       real = xr@Wr^T - xi@Wi^T + (br - bi)
       imag = xi@Wr^T + xr@Wi^T + (br + bi)
    Grid = (m, n, k); k is the reduction axis (accumulators in VMEM scratch)."""
    k = pl.program_id(2)

    @pl.when(k == 0)
    def _():
        accr_ref[...] = jnp.zeros_like(accr_ref)
        acci_ref[...] = jnp.zeros_like(acci_ref)

    xr = xr_ref[...]
    xi = xi_ref[...]
    wr = wr_ref[...]
    wi = wi_ref[...]
    accr_ref[...] += (jnp.dot(xr, wr, preferred_element_type=jnp.float32)
                      - jnp.dot(xi, wi, preferred_element_type=jnp.float32))
    acci_ref[...] += (jnp.dot(xi, wr, preferred_element_type=jnp.float32)
                      + jnp.dot(xr, wi, preferred_element_type=jnp.float32))

    @pl.when(k == pl.num_programs(2) - 1)
    def _():
        or_ref[...] = (accr_ref[...] + br_ref[...]).astype(or_ref.dtype)
        oi_ref[...] = (acci_ref[...] + bi_ref[...]).astype(oi_ref.dtype)


def _shared_linear_kernel(xr_ref, xi_ref, wr_ref, b_ref,
                          or_ref, oi_ref, accr_ref, acci_ref):
    """complex_kernel=False tile: real = xr@Wr^T + br, imag = xi@Wr^T + br.
    One weight, two dots — no zero blocks, no duplicated weight bytes."""
    k = pl.program_id(2)

    @pl.when(k == 0)
    def _():
        accr_ref[...] = jnp.zeros_like(accr_ref)
        acci_ref[...] = jnp.zeros_like(acci_ref)

    wr = wr_ref[...]
    accr_ref[...] += jnp.dot(xr_ref[...], wr, preferred_element_type=jnp.float32)
    acci_ref[...] += jnp.dot(xi_ref[...], wr, preferred_element_type=jnp.float32)

    @pl.when(k == pl.num_programs(2) - 1)
    def _():
        b = b_ref[...]
        or_ref[...] = (accr_ref[...] + b).astype(or_ref.dtype)
        oi_ref[...] = (acci_ref[...] + b).astype(oi_ref.dtype)


# --------------------------- parameter packing (once) ------------------------

def pack_complex_linear_params(w_r, b_r, w_i=None, b_i=None, *, complex_kernel=False):
    """Transpose PyTorch-layout weights (N, K) -> (K, N) and fold biases once.

    Returns:
      complex_kernel=True : (Wr^T, Wi^T, (br-bi)[1,N], (br+bi)[1,N])
      complex_kernel=False: (Wr^T, br[1,N])
    """
    wr_t = jnp.asarray(w_r, jnp.float32).T                       # (K, N)
    br = jnp.asarray(b_r, jnp.float32)
    if complex_kernel:
        wi_t = jnp.asarray(w_i, jnp.float32).T                   # (K, N)
        bi = jnp.asarray(b_i, jnp.float32)
        return (wr_t, wi_t, (br - bi).reshape(1, -1), (br + bi).reshape(1, -1))
    return (wr_t, br.reshape(1, -1))


# ------------------------------ tile selection --------------------------------

def _round_up(x, m):
    return ((x + m - 1) // m) * m


def _vmem_budget_and_limit():
    """Generation-aware VMEM budgets (v5e/v6e: 128 MiB, v7x: 64 MiB per TC)."""
    mib = 1024 * 1024
    try:
        cap = int(pltpu.get_tpu_info().vmem_capacity_bytes)
    except Exception:
        cap = 64 * mib                                   # conservative fallback
    budget = min(max(24 * mib, int(cap * 0.55)), 96 * mib)   # for tile sizing
    limit = min(max(32 * mib, int(cap * 0.70)), 112 * mib)   # scoped VMEM limit
    return budget, limit


def _choose_tiles(M, K, N, complex_kernel, use_bf16, budget_bytes):
    """Pick (tm, tn, tk).  K tiles must divide K exactly (reduction correctness);
    M / N edge tiles may be ragged (masked writes)."""
    itemsize = 2 if use_bf16 else 4

    # Reduction tile: full K unless K is large and evenly divisible by a big chunk.
    tk = K
    if K > 2048:
        for cand in (2048, 1024, 512, 256, 128):
            if K % cand == 0:
                tk = cand
                break

    # Output-feature tile (lane axis): full N if small, else 512-wide tiles.
    tn = N if N <= 512 else 512

    # Row tile from the VMEM budget.  Default pipeline double-buffers each block.
    n_w = 2 if complex_kernel else 1                      # Wr (+ Wi)
    n_b = 2 if complex_kernel else 1
    fixed = 2 * itemsize * n_w * tk * tn + 2 * 4 * n_b * tn
    per_row = (2 * itemsize * 2 * tk        # xr + xi tiles (double buffered)
               + 2 * 4 * 2 * tn             # real + imag out tiles (double buffered)
               + 4 * 2 * tn)                # two f32 accumulators (single buffer)
    avail = max(budget_bytes - fixed, per_row * 8)
    tm = int(avail // per_row) // 8 * 8
    tm = max(8, min(512, tm))
    tm = min(tm, _round_up(M, 8))

    # Ensure at least two parallel grid points so a 2-TC chip (v7x) isn't half idle.
    if pl.cdiv(M, tm) * pl.cdiv(N, tn) == 1:
        if M > 8:
            tm = _round_up((M + 1) // 2, 8)
        elif N >= 256:
            tn = max(128, (N // 2) // 128 * 128)
    return tm, tn, tk


# ------------------------------ forward wrapper --------------------------------

@partial(jax.jit, static_argnames=("complex_kernel", "use_bf16"))
def complex_linear_forward(x_real, x_imag, params, *, complex_kernel=False,
                           use_bf16=False):
    """ComplexLinear.forward.

    x_real / x_imag : (..., in_features) float32 (real/imag parts of the input)
    params          : tuple from pack_complex_linear_params
    Returns complex64 of shape (..., out_features).
    """
    lead = x_real.shape[:-1]
    K = x_real.shape[-1]
    M = int(math.prod(lead)) if lead else 1

    if complex_kernel:
        wr_t, wi_t, b_real, b_imag = params
    else:
        wr_t, b_shared = params
    N = wr_t.shape[-1]

    # bf16 inputs (f32 MXU accumulate) for v6e/v7x throughput; gated because it
    # will generally not hold a 1e-5 tolerance for large K.
    in_dtype = jnp.bfloat16 if use_bf16 else jnp.float32
    xr = x_real.reshape(M, K).astype(in_dtype)
    xi = x_imag.reshape(M, K).astype(in_dtype)
    wr = wr_t.astype(in_dtype)

    budget, vmem_limit = _vmem_budget_and_limit()
    tm, tn, tk = _choose_tiles(M, K, N, complex_kernel, use_bf16, budget)
    m_tiles, n_tiles, k_tiles = pl.cdiv(M, tm), pl.cdiv(N, tn), pl.cdiv(K, tk)
    grid = (m_tiles, n_tiles, k_tiles)

    x_spec = pl.BlockSpec((tm, tk), lambda m, n, k: (m, k))
    w_spec = pl.BlockSpec((tk, tn), lambda m, n, k: (k, n))
    b_spec = pl.BlockSpec((1, tn), lambda m, n, k: (0, n))
    o_spec = pl.BlockSpec((tm, tn), lambda m, n, k: (m, n))

    itemsize = 2 if use_bf16 else 4
    if complex_kernel:
        wi = wi_t.astype(in_dtype)
        kernel = _complex_linear_kernel
        inputs = (xr, xi, wr, wi, b_real, b_imag)
        in_specs = [x_spec, x_spec, w_spec, w_spec, b_spec, b_spec]
        flops = 8 * M * K * N
        weight_bytes = 2 * K * N * itemsize
        bias_bytes = 2 * N * 4
    else:
        kernel = _shared_linear_kernel
        inputs = (xr, xi, wr, b_shared)
        in_specs = [x_spec, x_spec, w_spec, b_spec]
        flops = 4 * M * K * N
        weight_bytes = K * N * itemsize
        bias_bytes = N * 4

    cost = pl.CostEstimate(
        flops=flops,
        transcendentals=0,
        bytes_accessed=2 * M * K * itemsize + weight_bytes + bias_bytes
                       + 2 * M * N * 4,
    )

    out_r, out_i = pl.pallas_call(
        kernel,
        out_shape=(jax.ShapeDtypeStruct((M, N), jnp.float32),
                   jax.ShapeDtypeStruct((M, N), jnp.float32)),
        grid=grid,
        in_specs=in_specs,
        out_specs=(o_spec, o_spec),
        scratch_shapes=[pltpu.VMEM((tm, tn), jnp.float32),
                        pltpu.VMEM((tm, tn), jnp.float32)],
        compiler_params=pltpu.CompilerParams(
            dimension_semantics=("parallel", "parallel", "arbitrary"),
            vmem_limit_bytes=vmem_limit,
        ),
        cost_estimate=cost,
    )(*inputs)

    result = jax.lax.complex(out_r, out_i)                 # complex64
    return result.reshape(*lead, N)


# --------------------------- deterministic param init --------------------------

def init_linear_params(key, in_features, out_features):
    """PyTorch nn.Linear default init: U(-1/sqrt(in), 1/sqrt(in))."""
    kw, kb = jax.random.split(key)
    bound = 1.0 / math.sqrt(in_features)
    w = jax.random.uniform(kw, (out_features, in_features), jnp.float32,
                           -bound, bound)
    b = jax.random.uniform(kb, (out_features,), jnp.float32, -bound, bound)
    return w, b


# ------------------------------------ main -------------------------------------

if __name__ == "__main__":
    key = jax.random.PRNGKey(0)
    k_xr, k_xi, k_lr, k_li = jax.random.split(key, 4)

    batch, seq, in_features, out_features = 2, 8, 32, 64

    x_real = jax.random.normal(k_xr, (batch, seq, in_features), jnp.float32)
    x_imag = jax.random.normal(k_xi, (batch, seq, in_features), jnp.float32)

    w_r, b_r = init_linear_params(k_lr, in_features, out_features)
    w_i, b_i = init_linear_params(k_li, in_features, out_features)

    # Pack parameters once (transpose / bias folding hoisted out of the forward).
    params_ck = pack_complex_linear_params(w_r, b_r, w_i, b_i, complex_kernel=True)
    params_sh = pack_complex_linear_params(w_r, b_r, complex_kernel=False)

    # complex_kernel=True path
    out_ck = jax.block_until_ready(
        complex_linear_forward(x_real, x_imag, params_ck, complex_kernel=True))
    # complex_kernel=False path
    out_sh = jax.block_until_ready(
        complex_linear_forward(x_real, x_imag, params_sh, complex_kernel=False))

    # Pure-JAX reference mirroring the PyTorch forward exactly.
    def lin(x, w, b):
        return x @ w.T + b

    ref_ck = (lin(x_real, w_r, b_r) - lin(x_imag, w_i, b_i)) \
        + 1j * (lin(x_imag, w_r, b_r) + lin(x_real, w_i, b_i))
    ref_sh = lin(x_real, w_r, b_r) + 1j * lin(x_imag, w_r, b_r)

    assert out_ck.shape == (batch, seq, out_features)
    assert out_ck.dtype == jnp.complex64
    assert out_sh.shape == (batch, seq, out_features)
    assert out_sh.dtype == jnp.complex64
    assert jnp.allclose(out_ck, ref_ck, atol=1e-5, rtol=1e-5)
    assert jnp.allclose(out_sh, ref_sh, atol=1e-5, rtol=1e-5)

    print("KERNEL_OK")
</pallas_src>

<mosaic_0001>
module attributes {stable_mosaic.version = 11 : i64} {
  func.func @_complex_linear_kernel(%arg0: i32, %arg1: i32, %arg2: i32, %arg3: memref<8x32xf32, #tpu.memory_space<vmem>>, %arg4: memref<8x32xf32, #tpu.memory_space<vmem>>, %arg5: memref<32x64xf32, #tpu.memory_space<vmem>>, %arg6: memref<32x64xf32, #tpu.memory_space<vmem>>, %arg7: memref<1x64xf32, #tpu.memory_space<vmem>>, %arg8: memref<1x64xf32, #tpu.memory_space<vmem>>, %arg9: memref<8x64xf32, #tpu.memory_space<vmem>>, %arg10: memref<8x64xf32, #tpu.memory_space<vmem>>, %arg11: memref<8x64xf32, #tpu.memory_space<vmem>>, %arg12: memref<8x64xf32, #tpu.memory_space<vmem>>) attributes {dimension_semantics = [#tpu.dimension_semantics<parallel>, #tpu.dimension_semantics<parallel>, #tpu.dimension_semantics<arbitrary>], iteration_bounds = array<i64: 2, 1, 1>, scalar_prefetch = 0 : i64, scratch_operands = 2 : i64, tpu.core_type = #tpu.core_type<tc>, window_params = [{transform_indices = @transform_0, window_bounds = array<i64: 8, 32>}, {transform_indices = @transform_1, window_bounds = array<i64: 8, 32>}, {transform_indices = @transform_2, window_bounds = array<i64: 32, 64>}, {transform_indices = @transform_3, window_bounds = array<i64: 32, 64>}, {transform_indices = @transform_4, window_bounds = array<i64: 1, 64>}, {transform_indices = @transform_5, window_bounds = array<i64: 1, 64>}, {transform_indices = @transform_6, window_bounds = array<i64: 8, 64>}, {transform_indices = @transform_7, window_bounds = array<i64: 8, 64>}]} {
    %c0_i32 = arith.constant 0 : i32
    %0 = arith.cmpi eq, %arg2, %c0_i32 : i32
    %1 = arith.extui %0 : i1 to i32
    %c0_i32_0 = arith.constant 0 : i32
    %2 = arith.cmpi ne, %1, %c0_i32_0 : i32
    scf.if %2 {
      %cst_21 = arith.constant 0.000000e+00 : f32
      %22 = vector.broadcast %cst_21 : f32 to vector<8x64xf32>
      %c0_22 = arith.constant 0 : index
      %c0_23 = arith.constant 0 : index
      %23 = vector.load %arg11[%c0_22, %c0_23] : memref<8x64xf32, #tpu.memory_space<vmem>>, vector<8x64xf32>
      tpu.vector_store %arg11[%c0_22, %c0_23], %22 {strides = array<i32>} : memref<8x64xf32, #tpu.memory_space<vmem>>, vector<8x64xf32>,
      %cst_24 = arith.constant 0.000000e+00 : f32
      %24 = vector.broadcast %cst_24 : f32 to vector<8x64xf32>
      %c0_25 = arith.constant 0 : index
      %c0_26 = arith.constant 0 : index
      %25 = vector.load %arg12[%c0_25, %c0_26] : memref<8x64xf32, #tpu.memory_space<vmem>>, vector<8x64xf32>
      tpu.vector_store %arg12[%c0_25, %c0_26], %24 {strides = array<i32>} : memref<8x64xf32, #tpu.memory_space<vmem>>, vector<8x64xf32>,
    } else {
    }
    %c0 = arith.constant 0 : index
    %c0_1 = arith.constant 0 : index
    %3 = vector.load %arg3[%c0, %c0_1] : memref<8x32xf32, #tpu.memory_space<vmem>>, vector<8x32xf32>
    %c0_2 = arith.constant 0 : index
    %c0_3 = arith.constant 0 : index
    %4 = vector.load %arg4[%c0_2, %c0_3] : memref<8x32xf32, #tpu.memory_space<vmem>>, vector<8x32xf32>
    %c0_4 = arith.constant 0 : index
    %c0_5 = arith.constant 0 : index
    %5 = vector.load %arg5[%c0_4, %c0_5] : memref<32x64xf32, #tpu.memory_space<vmem>>, vector<32x64xf32>
    %c0_6 = arith.constant 0 : index
    %c0_7 = arith.constant 0 : index
    %6 = vector.load %arg6[%c0_6, %c0_7] : memref<32x64xf32, #tpu.memory_space<vmem>>, vector<32x64xf32>
    %c0_8 = arith.constant 0 : index
    %c0_9 = arith.constant 0 : index
    %7 = vector.load %arg11[%c0_8, %c0_9] : memref<8x64xf32, #tpu.memory_space<vmem>>, vector<8x64xf32>
    %cst = arith.constant dense<0.000000e+00> : vector<8x64xf32>
    %8 = tpu.matmul %3, %5, %cst {dimension_numbers = #tpu.dot_dimension_numbers<[1], [0], [0], [1], [0, 0, 1, 1], [], []>} : vector<8x32xf32>, vector<32x64xf32>, vector<8x64xf32> -> vector<8x64xf32>
    %cst_10 = arith.constant dense<0.000000e+00> : vector<8x64xf32>
    %9 = tpu.matmul %4, %6, %cst_10 {dimension_numbers = #tpu.dot_dimension_numbers<[1], [0], [0], [1], [0, 0, 1, 1], [], []>} : vector<8x32xf32>, vector<32x64xf32>, vector<8x64xf32> -> vector<8x64xf32>
    %10 = arith.subf %8, %9 : vector<8x64xf32>
    %11 = arith.addf %7, %10 : vector<8x64xf32>
    %c0_11 = arith.constant 0 : index
    %c0_12 = arith.constant 0 : index
    %12 = vector.load %arg11[%c0_11, %c0_12] : memref<8x64xf32, #tpu.memory_space<vmem>>, vector<8x64xf32>
    tpu.vector_store %arg11[%c0_11, %c0_12], %11 {strides = array<i32>} : memref<8x64xf32, #tpu.memory_space<vmem>>, vector<8x64xf32>,
    %c0_13 = arith.constant 0 : index
    %c0_14 = arith.constant 0 : index
    %13 = vector.load %arg12[%c0_13, %c0_14] : memref<8x64xf32, #tpu.memory_space<vmem>>, vector<8x64xf32>
    %cst_15 = arith.constant dense<0.000000e+00> : vector<8x64xf32>
    %14 = tpu.matmul %4, %5, %cst_15 {dimension_numbers = #tpu.dot_dimension_numbers<[1], [0], [0], [1], [0, 0, 1, 1], [], []>} : vector<8x32xf32>, vector<32x64xf32>, vector<8x64xf32> -> vector<8x64xf32>
    %cst_16 = arith.constant dense<0.000000e+00> : vector<8x64xf32>
    %15 = tpu.matmul %3, %6, %cst_16 {dimension_numbers = #tpu.dot_dimension_numbers<[1], [0], [0], [1], [0, 0, 1, 1], [], []>} : vector<8x32xf32>, vector<32x64xf32>, vector<8x64xf32> -> vector<8x64xf32>
    %16 = arith.addf %14, %15 : vector<8x64xf32>
    %17 = arith.addf %13, %16 : vector<8x64xf32>
    %c0_17 = arith.constant 0 : index
    %c0_18 = arith.constant 0 : index
    %18 = vector.load %arg12[%c0_17, %c0_18] : memref<8x64xf32, #tpu.memory_space<vmem>>, vector<8x64xf32>
    tpu.vector_store %arg12[%c0_17, %c0_18], %17 {strides = array<i32>} : memref<8x64xf32, #tpu.memory_space<vmem>>, vector<8x64xf32>,
    %c0_i32_19 = arith.constant 0 : i32
    %19 = arith.cmpi eq, %arg2, %c0_i32_19 : i32
    %20 = arith.extui %19 : i1 to i32
    %c0_i32_20 = arith.constant 0 : i32
    %21 = arith.cmpi ne, %20, %c0_i32_20 : i32
    scf.if %21 {
      %c0_21 = arith.constant 0 : index
      %c0_22 = arith.constant 0 : index
      %22 = vector.load %arg11[%c0_21, %c0_22] : memref<8x64xf32, #tpu.memory_space<vmem>>, vector<8x64xf32>
      %c0_23 = arith.constant 0 : index
      %c0_24 = arith.constant 0 : index
      %23 = vector.load %arg7[%c0_23, %c0_24] : memref<1x64xf32, #tpu.memory_space<vmem>>, vector<1x64xf32>
      %24 = vector.broadcast %23 : vector<1x64xf32> to vector<8x64xf32>
      %25 = arith.addf %22, %24 : vector<8x64xf32>
      %c0_25 = arith.constant 0 : index
      %c0_26 = arith.constant 0 : index
      %26 = vector.load %arg9[%c0_25, %c0_26] : memref<8x64xf32, #tpu.memory_space<vmem>>, vector<8x64xf32>
      tpu.vector_store %arg9[%c0_25, %c0_26], %25 {strides = array<i32>} : memref<8x64xf32, #tpu.memory_space<vmem>>, vector<8x64xf32>,
      %c0_27 = arith.constant 0 : index
      %c0_28 = arith.constant 0 : index
      %27 = vector.load %arg12[%c0_27, %c0_28] : memref<8x64xf32, #tpu.memory_space<vmem>>, vector<8x64xf32>
      %c0_29 = arith.constant 0 : index
      %c0_30 = arith.constant 0 : index
      %28 = vector.load %arg8[%c0_29, %c0_30] : memref<1x64xf32, #tpu.memory_space<vmem>>, vector<1x64xf32>
      %29 = vector.broadcast %28 : vector<1x64xf32> to vector<8x64xf32>
      %30 = arith.addf %27, %29 : vector<8x64xf32>
      %c0_31 = arith.constant 0 : index
      %c0_32 = arith.constant 0 : index
      %31 = vector.load %arg10[%c0_31, %c0_32] : memref<8x64xf32, #tpu.memory_space<vmem>>, vector<8x64xf32>
      tpu.vector_store %arg10[%c0_31, %c0_32], %30 {strides = array<i32>} : memref<8x64xf32, #tpu.memory_space<vmem>>, vector<8x64xf32>,
    } else {
    }
    return
  }
  func.func @transform_0(%arg0: i32, %arg1: i32, %arg2: i32) -> (i32, i32) {
    %c0_i32 = arith.constant 0 : i32
    return %arg0, %arg2 : i32, i32
  }
  func.func @transform_1(%arg0: i32, %arg1: i32, %arg2: i32) -> (i32, i32) {
    %c0_i32 = arith.constant 0 : i32
    return %arg0, %arg2 : i32, i32
  }
  func.func @transform_2(%arg0: i32, %arg1: i32, %arg2: i32) -> (i32, i32) {
    %c0_i32 = arith.constant 0 : i32
    return %arg2, %arg1 : i32, i32
  }
  func.func @transform_3(%arg0: i32, %arg1: i32, %arg2: i32) -> (i32, i32) {
    %c0_i32 = arith.constant 0 : i32
    return %arg2, %arg1 : i32, i32
  }
  func.func @transform_4(%arg0: i32, %arg1: i32, %arg2: i32) -> (i32, i32) {
    %c0_i32 = arith.constant 0 : i32
    %c0_i32_0 = arith.constant 0 : i32
    return %c0_i32, %arg1 : i32, i32
  }
  func.func @transform_5(%arg0: i32, %arg1: i32, %arg2: i32) -> (i32, i32) {
    %c0_i32 = arith.constant 0 : i32
    %c0_i32_0 = arith.constant 0 : i32
    return %c0_i32, %arg1 : i32, i32
  }
  func.func @transform_6(%arg0: i32, %arg1: i32, %arg2: i32) -> (i32, i32) {
    %c0_i32 = arith.constant 0 : i32
    return %arg0, %arg1 : i32, i32
  }
  func.func @transform_7(%arg0: i32, %arg1: i32, %arg2: i32) -> (i32, i32) {
    %c0_i32 = arith.constant 0 : i32
    return %arg0, %arg1 : i32, i32
  }
}

</mosaic_0001>

<bundles_post_ra>
// kernel: custom-call
= control target key start
LH: loop header
LB: loop body
LE: loop exit
PB: predicated region body
PF: predicated region fallthrough
CT: control target
= control target key end

     0   :  { %s126_s0 = inlined_call_operand.vmem [shape: f32[2,8,64], index: 0, kind: input, shape index: {}]   ;;  %s127_s1 = inlined_call_operand.vmem [shape: f32[2,8,64], index: 1, kind: input, shape index: {}]   ;;  %s128_s2 = inlined_call_operand.hbm [shape: c64[2,8,64], index: 2, kind: output, shape index: {}]  }
   0x1   :  { %s87_s11 = scalar_lea.hbm %s128_s2, 256 }
   0x2   :  { %4 = vsyncpa [#allocation0], 0  ;;  %s5_s14 = sshll.u32 %s126_s0, 4  ;;  %s6_s14 = int_to_ptr.vmem [resolvable:$true] %s5_s14 }
   0x3   :  { %s18_s15 = scalar_lea.vmem %s6_s14, 256  ;;  %p23_p1 = scmp.lt.s32.totalorder %s6_s14, %s6_s14 }
   0x4   :  { %p19_p0 = scmp.ne.s32.totalorder %s6_s14, %s18_s15  ;;  %p24_p2 = scmp.lt.s32.totalorder %s18_s15, %s18_s15 }
   0x6   :  { %p25_p3 = por %p24_p2, %p23_p1 }
   0x8   :  { %p26_p4 = pnand %p25_p3, %p19_p0 }
   0xa   :  { %29 = shalt.err (!%p26_p4)  }
   0xb   :  { %p31_p5 = scmp.ne.s32.totalorder %s128_s2, %s87_s11  ;;  %s32_s0 = scalar_lea.hbm %s128_s2, 512 }
   0xc   :  { %p33_p6 = scmp.lt.u32.totalorder %s32_s0, %s87_s11  ;;  %p34_p7 = scmp.lt.u32.totalorder %s87_s11, %s128_s2 }
   0xe   :  { %p35_p8 = por %p34_p7, %p33_p6 }
  0x10   :  { %p36_p9 = pnand %p35_p8, %p31_p5 }
  0x12   :  { %39 = shalt.err (!%p36_p9)  }
  0x13   :  { %8 = dma.vmem_to_hbm [thread:$0]  %s6_s14, 256, %s128_s2, [#allocation0] }
  0x14   :  { %65 = dma.done.wait [#allocation0], 256  }
  0x15   :  { %66 = vsyncadd [#allocation0], 4294967040 }
  0x16   :  { %10 = vsyncpa [#allocation0], 1 }
  0x17   :  { %11 = vsyncpa [#allocation1], 0  ;;  %s12_s28 = sshll.u32 %s127_s1, 4  ;;  %s13_s28 = int_to_ptr.vmem [resolvable:$true] %s12_s28 }
  0x18   :  { %s40_s29 = scalar_lea.vmem %s13_s28, 256  ;;  %p45_p11 = scmp.lt.s32.totalorder %s13_s28, %s13_s28 }
  0x19   :  { %p41_p10 = scmp.ne.s32.totalorder %s13_s28, %s40_s29  ;;  %p46_p12 = scmp.lt.s32.totalorder %s40_s29, %s40_s29 }
  0x1b   :  { %p47_p13 = por %p46_p12, %p45_p11 }
  0x1d   :  { %p48_p0 = pnand %p47_p13, %p41_p10 }
  0x1f   :  { %51 = shalt.err (!%p48_p0)  }
  0x20   :  { %p53_p1 = scmp.ne.s32.totalorder %s87_s11, %s32_s0  ;;  %p56_p2 = scmp.lt.u32.totalorder %s32_s0, %s32_s0 }
  0x22   :  { %p57_p3 = por %p56_p2, %p34_p7 }
  0x24   :  { %p59_p4 = por %p57_p3, %p33_p6 }
  0x26   :  { %p60_p5 = pnand %p59_p4, %p53_p1 }
  0x28   :  { %63 = shalt.err (!%p60_p5)  }
  0x29   :  { %15 = dma.vmem_to_hbm [thread:$0]  %s13_s28, 256, %s87_s11, [#allocation1] }
  0x2a   :  { %67 = dma.done.wait [#allocation1], 256  }
  0x2b   :  { %68 = vsyncadd [#allocation1], 4294967040 }
  0x2c   :  { %17 = vsyncpa [#allocation1], 1 }

// kernel: complex_linear_forward.1
= control target key start
LH: loop header
LB: loop body
LE: loop exit
PB: predicated region body
PF: predicated region fallthrough
CT: control target
= control target key end

     0   :  { %s1696_s0 = inlined_call_operand.hbm [shape: f32[16,32], index: 0, kind: input, shape index: {}]   ;;  %s1697_s1 = inlined_call_operand.hbm [shape: f32[16,32], index: 1, kind: input, shape index: {}]   ;;  %s1698_s2 = inlined_call_operand.hbm [shape: f32[32,64], index: 2, kind: input, shape index: {}]   ;;  %s1699_s3 = inlined_call_operand.hbm [shape: f32[32,64], index: 3, kind: input, shape index: {}]   ;;  %s1700_s4 = inlined_call_operand.vmem [shape: f32[1,64], index: 4, kind: input, shape index: {}]   ;;  %s1701_s5 = inlined_call_operand.vmem [shape: f32[1,64], index: 5, kind: input, shape index: {}]   ;;  %s1702_s6 = inlined_call_operand.vmem [shape: f32[16,64], index: 6, kind: output, shape index: {0}]   ;;  %s1703_s7 = inlined_call_operand.vmem [shape: f32[16,64], index: 7, kind: output, shape index: {1}]  }
   0x1   :  { %1710 = sst [smem:[#allocation16_spill]] %s1698_s2 }
   0x2   :  { %1711 = sst [smem:[#allocation17_spill]] %s1699_s3 }
   0x3   :  { %13 = vsyncpa [#allocation5], 0 }
   0x4   :  { %15 = vsyncpa [#allocation5 + $0x1], 0 }
   0x5   :  { %16 = vsyncpa [#allocation7], 0 }
   0x6   :  { %18 = vsyncpa [#allocation7 + $0x1], 0 }
   0x7   :  { %19 = vsyncpa [#allocation10], 0  ;;  %s1432_s24 = smov 0   ;;  %s1434_s25 = smov 0  }
   0x8   :  { %s1436_s26 = smov 0   ;;  %s1438_s27 = smov 0  }
   0x9   :  { %s1440_s28 = smov 0   ;;  %s1442_s29 = smov 0  }
   0xa LB: > { %s1708_s30 = sadd.s32 4294967295, %s1381_s29   ;;  %p66_p0 = scmp.ne.s32.totalorder %s1365_s25, %s1361_s24  ;;  %s1381_s29 = sphi %s1442_s29, %s25_s29   ;;  %s1377_s28 = sphi %s1440_s28, %s1729_s28   ;;  %s1373_s27 = sphi %s1438_s27, %s1728_s27   ;;  %s1369_s26 = sphi %s1436_s26, %s1727_s26   ;;  %s1365_s25 = sphi %s1434_s25, %s1726_s25   ;;  %s1361_s24 = sphi %s1432_s24, %s1725_s24  }
   0xb   : > { %p1464_p1 = scmp.eq.s32.totalorder %s1708_s30, 0  ;;  %p1004_p2 = scmp.ge.s32.totalorder %s1381_s29, 1 }
   0xc   : > { %p269_p3 = scmp.lt.s32.totalorder %s1381_s29, 3  ;;  %s1383_s11 = smov [#allocation8]  }
   0xd   : > { %s1712_s8 = scalar_select %p1464_p1, 1, 0 }
   0xe   : > { %p1472_p4 = por %p1464_p1, %p66_p0  ;;  %p1476_p5 = pnand %p1004_p2, %p269_p3 }
   0xf   : > { %s285_s12 = sshll.u32 %s1383_s11, 4  ;;  %s1384_s14 = smov [#allocation9]   ;;  %s286_s12 = int_to_ptr.vmem [resolvable:$true] %s285_s12 }
  0x10   : > { %s1713_s9 = scalar_select %p1472_p4, 1, 0 }
  0x11   : > { %s1714_s10 = scalar_select %p1476_p5, 1, 0 }
  0x12   : > { %p1129_p6 = pneg %p1476_p5  ;;  %s302_s15 = sshll.u32 %s1384_s14, 4  ;;  %s1488_s15 = int_to_ptr.vmem [resolvable:$true] %s302_s15 }
  0x13   : > { %s1716_s2 = sld [smem:[#allocation16_spill]] }
  0x14   : > { %p1484_p7 = pnand %p1129_p6, %p1464_p1 }
  0x16   : > { %p1205_p9 = pneg %p1484_p7 }
  0x19   : > { %s1203_s18 = scalar_lea.hbm %s1716_s2, 512 }
  0x1a   : > { %p1204_p8 = scmp.ne.s32.totalorder %s1716_s2, %s1203_s18  ;;  %p1210_p12 = scmp.lt.u32.totalorder %s1203_s18, %s1716_s2 }
  0x1c   : > { %p1206_p10 = pnand %p1205_p9, %p1204_p8 }
  0x1e   : > { %p1207_p11 = pneg %p1206_p10 }
  0x20   : > { %p1212_p13 = pnand %p1210_p12, %p1207_p11 }
  0x22   : > { %1215 = shalt.err (!%p1212_p13)
}
  0x23   : > { %s1216_s23 = scalar_lea.vmem %s286_s12, 512  ;;  %p1224_p6 = scmp.lt.s32.totalorder %s286_s12, %s286_s12 }
  0x24   : > { %p1217_p0 = scmp.ne.s32.totalorder %s286_s12, %s1216_s23  ;;  %p1225_p1 = scmp.lt.s32.totalorder %s1216_s23, %s1216_s23 }
  0x26   : > { %p1219_p2 = pnand %p1217_p0, %p1205_p9  ;;  %p1226_p4 = por %p1225_p1, %p1224_p6 }
  0x28   : > { %p1220_p3 = pneg %p1219_p2 }
  0x2a   : > { %p1227_p5 = pnand %p1226_p4, %p1220_p3 }
  0x2c   : > { %1230 = shalt.err (!%p1227_p5)
}
  0x2d   : > { %s1385_s24 = smov 128   ;;  %s1386_s11 = smov 8  }
  0x2e   : > { %1132 = dma.hbm_to_vmem [thread:$0]  (!%p1484_p7), %s1716_s2, 512, %s286_s12, [#allocation7], %s1385_s24, %s1385_s24, %s1386_s11  }
  0x2f   : > { %s1717_s3 = sld [smem:[#allocation17_spill]] }
  0x35   : > { %s1231_s19 = scalar_lea.hbm %s1717_s3, 512 }
  0x36   : > { %p1232_p8 = scmp.ne.s32.totalorder %s1717_s3, %s1231_s19  ;;  %p1238_p5 = scmp.lt.u32.totalorder %s1231_s19, %s1717_s3 }
  0x38   : > { %p1234_p1 = pnand %p1232_p8, %p1205_p9 }
  0x3a   : > { %p1235_p4 = pneg %p1234_p1 }
  0x3c   : > { %p1240_p10 = pnand %p1238_p5, %p1235_p4 }
  0x3e   : > { %1243 = shalt.err (!%p1240_p10)
}
  0x3f   : > { %s1244_s12 = scalar_lea.vmem %s1488_s15, 512  ;;  %p1252_p0 = scmp.lt.s32.totalorder %s1488_s15, %s1488_s15 }
  0x40   : > { %p1245_p11 = scmp.ne.s32.totalorder %s1488_s15, %s1244_s12  ;;  %p1253_p2 = scmp.lt.s32.totalorder %s1244_s12, %s1244_s12 }
  0x42   : > { %p1247_p12 = pnand %p1245_p11, %p1205_p9  ;;  %p1254_p3 = por %p1253_p2, %p1252_p0 }
  0x44   : > { %p1248_p13 = pneg %p1247_p12 }
  0x46   : > { %p1255_p6 = pnand %p1254_p3, %p1248_p13 }
  0x48   : > { %1258 = shalt.err (!%p1255_p6)
}
  0x49   : > { %1135 = dma.hbm_to_vmem [thread:$0]  (!%p1484_p7), %s1717_s3, 512, %s1488_s15, [#allocation10], %s1385_s24, %s1385_s24, %s1386_s11  }
  0x4a   : > { %s44_s17 = sadd.s32 1, %s1377_s28  ;;  %s53_s18 = sadd.s32 1, %s1369_s26 }
  0x4b   : > { %p46_p9 = scmp.ge.s32.totalorder %s44_s17, 2  ;;  %p60_p8 = scmp.ne.s32.totalorder %s1369_s26, %s1365_s25 }
  0x4c   : > { %p61_p1 = scmp.eq.s32.totalorder %s1381_s29, 0  ;;  %p1145_p4 = scmp.lt.s32.totalorder %s1381_s29, 2 }
  0x4d   : > { %s1731_s17 = smov (%p46_p9, %s44_s17), 0  ;;  %s328_s13 = sand.u32 1, %s1369_s26  }
  0x4e   : > { %1718 = sst [smem:[#allocation15_spill]] %s1731_s17  ;;  %p62_p5 = por %p61_p1, %p60_p8 }
  0x4f   : > { %s48_s19 = ssub.s32 %s1377_s28, %s1731_s17  ;;  %s1548_s20 = sshll.u32 %s328_s13, 3 }
  0x50   : > { %p51_p10 = scmp.eq.s32.totalorder %s48_s19, 0  ;;  %s1011_s21 = sshll.u32 %s1377_s28, 7 }
  0x51   : > { %s1557_s22 = scalar_lea.hbm %s1696_s0, %s1011_s21  ;;  %s332_s23 = scalar_lea.vmem [#allocation4], %s1548_s20 }
  0x52   : > { %s1552_s15 = scalar_select %p51_p10, %s1369_s26, %s53_s18  }
  0x53   : > { %s340_s12 = sshll.u32 %s332_s23, 4  ;;  %p1564_p7 = pnand %p1145_p4, %p62_p5  ;;  %s1560_s12 = int_to_ptr.vmem [resolvable:$true] %s340_s12 }
  0x54   : > { %s1571_s19 = scalar_lea.hbm %s1697_s1, %s1011_s21  ;;  %s347_s24 = sand.u32 1, %s1381_s29  }
  0x55   : > { %s329_s11 = scalar_lea.sflag [#allocation5], %s328_s13  ;;  %s1259_s30 = scalar_lea.hbm %s1557_s22, 128 }
  0x56   : > { %p1260_p11 = scmp.ne.s32.totalorder %s1557_s22, %s1259_s30  ;;  %p1261_p12 = pneg %p1564_p7 }
  0x57   : > { %s1264_s3 = scalar_lea.hbm %s1696_s0, 256  ;;  %p1265_p2 = scmp.lt.u32.totalorder %s1557_s22, %s1696_s0 }
  0x58   : > { %p1262_p13 = pnand %p1261_p12, %p1260_p11  ;;  %p1266_p3 = scmp.lt.u32.totalorder %s1264_s3, %s1259_s30 }
  0x59   : > { %p1268_p9 = scmp.lt.u32.totalorder %s1259_s30, %s1557_s22 }
  0x5a   : > { %p1263_p0 = pneg %p1262_p13  ;;  %p1267_p6 = por %p1266_p3, %p1265_p2 }
  0x5c   : > { %p1269_p8 = por %p1268_p9, %p1267_p6 }
  0x5e   : > { %p1270_p1 = pnand %p1269_p8, %p1263_p0 }
  0x60   : > { %1273 = shalt.err (!%p1270_p1)
}
  0x61   : > { %s1274_s13 = scalar_lea.vmem %s1560_s12, 128  ;;  %s1387_s2 = smov [#allocation4]  }
  0x62   : > { %p1275_p4 = scmp.ne.s32.totalorder %s1560_s12, %s1274_s13  ;;  %s1279_s21 = sshll.u32 %s1387_s2, 4  ;;  %s1280_s21 = int_to_ptr.vmem [resolvable:$false] %s1279_s21 }
  0x63   : > { %s1281_s17 = scalar_lea.vmem %s1280_s21, 256  ;;  %p1282_p11 = scmp.lt.s32.totalorder %s1560_s12, %s1280_s21 }
  0x64   : > { %p1277_p5 = pnand %p1275_p4, %p1261_p12  ;;  %p1283_p13 = scmp.lt.s32.totalorder %s1281_s17, %s1274_s13 }
  0x66   : > { %p1278_p10 = pneg %p1277_p5  ;;  %p1284_p2 = por %p1283_p13, %p1282_p11 }
  0x68   : > { %p1285_p3 = pnand %p1284_p2, %p1278_p10 }
  0x6a   : > { %1288 = shalt.err (!%p1285_p3)
}
  0x6b   : > { %1139 = dma.hbm_to_vmem [thread:$0]  (!%p1564_p7), %s1557_s22, 128, %s1560_s12, %s329_s11  }
  0x6c   : > { %s351_s3 = scalar_lea.vmem [#allocation6], %s1548_s20  ;;  %s348_s18 = scalar_lea.sflag [#allocation7], %s347_s24 }
  0x6d   : > { %s359_s30 = sshll.u32 %s351_s3, 4  ;;  %s1289_s23 = scalar_lea.hbm %s1571_s19, 128  ;;  %s360_s30 = int_to_ptr.vmem [resolvable:$true] %s359_s30 }
  0x6e   : > { %p1290_p0 = scmp.ne.s32.totalorder %s1571_s19, %s1289_s23  ;;  %s1294_s2 = scalar_lea.hbm %s1697_s1, 256 }
  0x6f   : > { %p1295_p8 = scmp.lt.u32.totalorder %s1571_s19, %s1697_s1  ;;  %p1296_p1 = scmp.lt.u32.totalorder %s1294_s2, %s1289_s23 }
  0x70   : > { %p1292_p6 = pnand %p1290_p0, %p1261_p12  ;;  %p1298_p5 = scmp.lt.u32.totalorder %s1289_s23, %s1571_s19 }
  0x71   : > { %p1297_p4 = por %p1296_p1, %p1295_p8 }
  0x72   : > { %p1293_p9 = pneg %p1292_p6 }
  0x73   : > { %p1299_p10 = por %p1298_p5, %p1297_p4 }
  0x75   : > { %p1300_p11 = pnand %p1299_p10, %p1293_p9 }
  0x77   : > { %1303 = shalt.err (!%p1300_p11)
}
  0x78   : > { %s1304_s20 = scalar_lea.vmem %s360_s30, 128  ;;  %s1388_s22 = smov [#allocation6]  }
  0x79   : > { %p1305_p13 = scmp.ne.s32.totalorder %s360_s30, %s1304_s20  ;;  %s1309_s12 = sshll.u32 %s1388_s22, 4  ;;  %s1310_s12 = int_to_ptr.vmem [resolvable:$false] %s1309_s12 }
  0x7a   : > { %s1311_s24 = scalar_lea.vmem %s1310_s12, 256  ;;  %p1312_p0 = scmp.lt.s32.totalorder %s360_s30, %s1310_s12 }
  0x7b   : > { %p1307_p2 = pnand %p1305_p13, %p1261_p12  ;;  %p1313_p6 = scmp.lt.s32.totalorder %s1311_s24, %s1304_s20 }
  0x7d   : > { %p1308_p3 = pneg %p1307_p2  ;;  %p1314_p1 = por %p1313_p6, %p1312_p0 }
  0x7f   : > { %p1315_p8 = pnand %p1314_p1, %p1308_p3 }
  0x81   : > { %1318 = shalt.err (!%p1315_p8)
}
  0x82   : > { %1142 = dma.hbm_to_vmem [thread:$0]  (!%p1564_p7), %s1571_s19, 128, %s360_s30, %s348_s18  }
  0x83   : > { %p1720_p9 = scmp.ne.s32.totalorder %s1714_s10, 0 }
  0x84   : > { %s370_s11 = sand.u32 (!%p1720_p9), 1, %s1365_s25   ;;  %p1721_p12 = scmp.ne.s32.totalorder (!%p1720_p9), %s1713_s9, 0 }
  0x85   : > { %368 = sbr.rel (%p1720_p9) target bundleno = 397 (0x18d), region = 44  ;;  %s1624_s3 = sshll.u32 (!%p1720_p9), %s370_s11, 3 }
  0x86   : > { %s371_s23 = scalar_lea.sflag (!%p1720_p9), [#allocation5], %s370_s11  ;;  %s374_s16 = scalar_lea.vmem (!%p1720_p9), [#allocation4], %s1624_s3 }
  0x8c   : > { %1344 = dma.done.wait (%p1721_p12), %s371_s23, 128  }
  0x8d   : > { %1346 = vsyncadd (%p1721_p12), %s371_s23, 4294967168  ;;  %s1722_s14 = sadd.s32 4294967295, %s1381_s29   ;;  %s383_s30 = scalar_lea.vmem [#allocation6], %s1624_s3 }
  0x8e   : > { %s379_s19 = sand.u32 1, %s1722_s14  }
  0x8f   : > { %s380_s10 = scalar_lea.sflag [#allocation7], %s379_s19 }
  0x90   : > { %1348 = dma.done.wait (%p1721_p12), %s380_s10, 128  }
  0x91   : > { %1350 = vsyncadd (%p1721_p12), %s380_s10, 4294967168  ;;  %p1723_p7 = scmp.ne.s32.totalorder %s1712_s8, 0 }
  0x93   : > { %1352 = dma.done.wait (%p1723_p7), [#allocation7], 512  }
  0x94   : > { %1354 = vsyncadd (%p1723_p7), [#allocation7], 4294966784 }
  0x95   : > { %1356 = dma.done.wait (%p1723_p7), [#allocation10], 512  }
  0x96   : > { %1358 = vsyncadd (%p1723_p7), [#allocation10], 4294966784  ;;  %v1389_v0 = vmov 0.0|0.0   ;;  %vm1390_vm0 = vmmov 0   ;;  %v1391_v1 = vmov 0.0   ;;  %v473_v2 = vld [vmem:[#allocation8] sm:$0xff] }
  0x97   : > { %1093 = vmatprep.subr.bf16.mxu0 %v1389_v0  ;;  %1099 = vmatprep.subr.bf16.mxu1 %v1389_v0  ;;  %v474_v3 = vld [vmem:[#allocation8 + $0x8] sm:$0xff]  ;;  %v477_v4 = vld [vmem:[#allocation9] sm:$0xff]  ;;  %v475_v7 = vld [vmem:[#allocation8 + $0x10] sm:$0xff]  ;;  %vm482_vm1 = vcmask 261120   ;;  %vm468_vm2 = vcmask 523264   ;;  %p450_p4 = scmp.lt.s32.totalorder %s1373_s27, 1 }
  0x98   : > { %1057 = vmatprep.mubr.msk.f32.mxu0 %vm1390_vm0, %v1391_v1  ;;  %1068 = vmatprep.mubr.msk.f32.mxu1 %vm1390_vm0, %v1391_v1  ;;  %v1094_v5 = vpack.c.bf16 %v474_v3, %v473_v2  ;;  %v478_v6 = vld [vmem:[#allocation9 + $0x8] sm:$0xff]  ;;  %v476_v8 = vld [vmem:[#allocation8 + $0x18] sm:$0xff]  ;;  %v479_v10 = vld [vmem:[#allocation9 + $0x10] sm:$0xff]  ;;  %469 = vst.msk [vmem:[#allocation2] sm:$0xff] %vm468_vm2, %v1391_v1 }
  0x99   : > { %v1100_v9 = vpack.c.bf16 %v478_v6, %v477_v4  ;;  %v480_v11 = vld [vmem:[#allocation9 + $0x18] sm:$0xff]  ;;  %v1097_v12 = vpack.c.bf16 %v476_v8, %v475_v7  ;;  %v471_v14 = vld [vmem:[%s374_s16] sm:$0xff]  ;;  %470 = vst.msk [vmem:[#allocation3] sm:$0xff] %vm468_vm2, %v1391_v1  ;;  %s1733_s27 = smov (!%p450_p4, %s1373_s27), 1  ;;  %v1025_v29 = vld [vmem:[%s1700_s4] ss:$0 sm:$0xff] }
  0x9a   : > { %1095 = vmatpush3.bf16.msra.mxu0 %v1094_v5  ;;  %v1103_v13 = vpack.c.bf16 %v480_v11, %v479_v10  ;;  %v472_v15 = vld [vmem:[%s383_s30] sm:$0xff]  ;;  %s1019_s8 = sshll.u32 %s1733_s27, 3 }
  0x9b   : > { %1101 = vmatpush3.bf16.msra.mxu1 %v1100_v9  ;;  %1096 = vmatprep.subr.bf16.mxu0 %v1389_v0  ;;  %s456_s21 = scalar_lea.vmem %s1702_s6, %s1019_s8  ;;  %v1026_v33 = vld [vmem:[%s1701_s5] ss:$0 sm:$0xff]  ;;  %s463_s12 = scalar_lea.vmem %s1703_s7, %s1019_s8 }
  0x9c   : > { %1102 = vmatprep.subr.bf16.mxu1 %v1389_v0 }
  0x9e   : > { %1098 = vmatpush3.bf16.msra.mxu0 %v1097_v12 }
  0x9f   : > { %1104 = vmatpush3.bf16.msra.mxu1 %v1103_v13  ;;  %1105 = vmatprep.subr.bf16.mxu0 %v1389_v0  ;;  %v481_v17 = vld [vmem:[#allocation2] sm:$0xff] }
  0xa0   : > { %1111 = vmatprep.subr.bf16.mxu1 %v1389_v0  ;;  %v633_v24 = vld [vmem:[#allocation3] sm:$0xff] }
  0xa1   : > { %1058 = vmatmul.mubr.msk.f32.vlgmr.msra.gmra.mrb[0].mxu0 %vm482_vm1, %v471_v14 }
  0xa2   : > { %1069 = vmatmul.mubr.msk.f32.vlgmr.msra.gmra.mrb[0].mxu1 %vm482_vm1, %v472_v15  ;;  %1107 = vmatpush3.bf16.msra.mxu0 %v1100_v9 }
  0xa3   : > { %1113 = vmatpush3.bf16.msra.mxu1 %v1094_v5  ;;  %1108 = vmatprep.subr.bf16.mxu0 %v1389_v0 }
  0xa4   : > { %1114 = vmatprep.subr.bf16.mxu1 %v1389_v0  ;;  %1079 = vmatprep.mubr.msk.f32.mxu0 %vm1390_vm0, %v1391_v1 }
  0xa5   : > { %1090 = vmatprep.mubr.msk.f32.mxu1 %vm1390_vm0, %v1391_v1 }
  0xa6   : > { %1110 = vmatpush3.bf16.msra.mxu0 %v1103_v13 }
  0xa7   : > { %1116 = vmatpush3.bf16.msra.mxu1 %v1097_v12 }
  0xa9   : > { %1080 = vmatmul.mubr.msk.f32.vlgmr.msra.gmra.mrb[2].mxu0 %vm482_vm1, %v471_v14 }
  0xaa   : > { %1091 = vmatmul.mubr.msk.f32.vlgmr.msra.gmra.mrb[2].mxu1 %vm482_vm1, %v472_v15 }
 0x174   : > { %v552_v16 = vpop.f32.mrb[0].mxu0 }
 0x175   : > { %v625_v18 = vpop.f32.mrb[0].mxu1  ;;  %v1059_v19 = vpop.f32.mrb[1].mxu0 }
 0x176   : > { %v629_v20 = vsub.f32 %v552_v16, %v625_v18  ;;  %v1070_v21 = vpop.f32.mrb[1].mxu1 }
 0x178   : > { %v630_v22 = vadd.f32 %v629_v20, %v481_v17 }
 0x17a   : > { %632 = vst.msk [vmem:[#allocation2] sm:$0xff] %vm468_vm2, %v630_v22 }
 0x17c   : > { %v700_v23 = vpop.f32.mrb[2].mxu0 }
 0x17d   : > { %v770_v25 = vpop.f32.mrb[2].mxu1  ;;  %v1081_v26 = vpop.f32.mrb[3].mxu0 }
 0x17e   : > { %v771_v27 = vadd.f32 %v770_v25, %v700_v23  ;;  %v1092_v28 = vpop.f32.mrb[3].mxu1 }
 0x180   : > { %v774_v30 = vadd.f32 %v771_v27, %v633_v24 }
 0x181   : > { %v779_v31 = vld [vmem:[#allocation2] sm:$0xff] }
 0x182   : > { %v787_v32 = vadd.f32 %v1025_v29, %v779_v31  ;;  %775 = vst.msk [vmem:[#allocation3] sm:$0xff] %vm468_vm2, %v774_v30 }
 0x184   : > { %788 = vst.msk [vmem:[%s456_s21] sm:$0xff] %vm468_vm2, %v787_v32 }
 0x189   : > { %v789_v34 = vld [vmem:[#allocation3] sm:$0xff] }
 0x18a   : > { %v797_v35 = vadd.f32 %v1026_v33, %v789_v34 }
 0x18c   : > { %798 = vst.msk [vmem:[%s463_s12] sm:$0xff] %vm468_vm2, %v797_v35 }
 0x18d PF: > { %s25_s29 = sadd.s32 1, %s1381_s29   ;;  %s1724_s11 = sld [smem:[#allocation15_spill]] }
 0x18e   : > { %p22_p5 = scmp.ge.s32.totalorder %s25_s29, 4   ;;  %s1725_s24 = smov %s1365_s25 }
 0x18f   : > { %s1726_s25 = smov %s1369_s26  ;;  %s1727_s26 = smov %s1552_s15 }
 0x190   : > { %s1728_s27 = smov %s1377_s28  ;;  %24 = sbr.rel (!%p22_p5) target bundleno = 10 (0xa), region = 133 }
 0x193   : > { %s1729_s28 = smov %s1724_s11 }
 0x197   :  { %844 = vsyncpa [#allocation5], 1 }
 0x198   :  { %846 = vsyncpa [#allocation5 + $0x1], 1 }
 0x199   :  { %847 = vsyncpa [#allocation7], 1 }
 0x19a   :  { %849 = vsyncpa [#allocation7 + $0x1], 1 }
 0x19b   :  { %850 = vsyncpa [#allocation10], 1 }

</bundles_post_ra>
